<compile_context>
chip_gen: v6e
topology: v6e:2x2x1
jax: 0.10.0
libtpu: 0.0.40
codegen_flags: <defaults>
</compile_context>

<pallas_src>
import jax
import jax.numpy as jnp
from jax.experimental import pallas as pl
from jax.experimental.pallas import tpu as pltpu


HIDDEN = 128


def _round_up(x, m):
    return (x + m - 1) // m * m


def _critic_kernel(s_ref, a_ref, w1_ref, b1_ref, w2h_ref, w2a_ref, b2_ref,
                   w3_ref, b3_ref, o_ref):
    # bf16 operands into the MXU, f32 accumulation, f32 elementwise.
    s = s_ref[...].astype(jnp.bfloat16)
    a = a_ref[...].astype(jnp.bfloat16)

    # fc1 + relu : (TB, S) @ (S, 128) + (1, 128)
    h1 = jnp.dot(s, w1_ref[...], preferred_element_type=jnp.float32)
    h1 = jnp.maximum(h1 + b1_ref[...], 0.0)

    # fc2 + relu on concat([h1, actions]) == h1 @ W2h + a @ W2a
    h2 = (jnp.dot(h1.astype(jnp.bfloat16), w2h_ref[...],
                  preferred_element_type=jnp.float32)
          + jnp.dot(a, w2a_ref[...], preferred_element_type=jnp.float32)
          + b2_ref[...])
    h2 = jnp.maximum(h2, 0.0)

    # fc3 as a VPU multiply + lane reduction instead of an N=1 MXU matmul.
    q = jnp.sum(h2 * w3_ref[...], axis=-1, keepdims=True) + b3_ref[0]
    o_ref[...] = q


def ddpg_critic_forward(states, actions, params, *, tile_b=256):
    """states: (B, S) f32, actions: (B, A) f32 -> (B, 1) f32 Q-values."""
    B, S = states.shape
    A = actions.shape[1]

    # Pad the action feature dim to a multiple of 8 (aligned sublane tile).
    A_pad = _round_up(max(A, 8), 8)

    # Batch tiling: at least 8 rows, at most tile_b, multiple of 8.
    tb = max(8, min(tile_b, _round_up(B, 8)))
    tb = _round_up(tb, 8)
    B_pad = _round_up(B, tb)
    grid = (B_pad // tb,)

    # Wrapper-side padding / dtype prep (zeros in padded rows/cols are exact).
    states_p = jnp.pad(states.astype(jnp.float32), ((0, B_pad - B), (0, 0)))
    actions_p = jnp.pad(actions.astype(jnp.float32),
                        ((0, B_pad - B), (0, A_pad - A)))

    w1 = params["w1"].astype(jnp.bfloat16)                                # (S, 128)
    w2h = params["w2h"].astype(jnp.bfloat16)                              # (128, 128)
    w2a = jnp.pad(params["w2a"],
                  ((0, A_pad - A), (0, 0))).astype(jnp.bfloat16)          # (A_pad, 128)
    b1 = params["b1"].astype(jnp.float32)                                 # (1, 128)
    b2 = params["b2"].astype(jnp.float32)                                 # (1, 128)
    w3_row = params["w3"].reshape(1, HIDDEN).astype(jnp.float32)          # (1, 128)
    b3 = params["b3"].reshape(1).astype(jnp.float32)                      # (1,)

    flops = 2 * B_pad * (S * HIDDEN + (HIDDEN + A_pad) * HIDDEN + HIDDEN)
    bytes_accessed = (B_pad * (S + A_pad + 1) * 4                # ins + out
                      + (S + HIDDEN + A_pad) * HIDDEN * 2        # bf16 weights
                      + (3 * HIDDEN + 1) * 4)                    # biases + w3

    out = pl.pallas_call(
        _critic_kernel,
        out_shape=jax.ShapeDtypeStruct((B_pad, 1), jnp.float32),
        grid=grid,
        in_specs=[
            pl.BlockSpec((tb, S), lambda i: (i, 0)),            # states
            pl.BlockSpec((tb, A_pad), lambda i: (i, 0)),        # actions
            pl.BlockSpec((S, HIDDEN), lambda i: (0, 0)),        # w1 (resident)
            pl.BlockSpec((1, HIDDEN), lambda i: (0, 0)),        # b1
            pl.BlockSpec((HIDDEN, HIDDEN), lambda i: (0, 0)),   # w2h
            pl.BlockSpec((A_pad, HIDDEN), lambda i: (0, 0)),    # w2a
            pl.BlockSpec((1, HIDDEN), lambda i: (0, 0)),        # b2
            pl.BlockSpec((1, HIDDEN), lambda i: (0, 0)),        # w3 row
            pl.BlockSpec(memory_space=pltpu.MemorySpace.SMEM),  # b3 scalar
        ],
        out_specs=pl.BlockSpec((tb, 1), lambda i: (i, 0)),
        compiler_params=pltpu.CompilerParams(
            dimension_semantics=("parallel",)),
        cost_estimate=pl.CostEstimate(
            flops=flops, transcendentals=0, bytes_accessed=bytes_accessed),
    )(states_p, actions_p, w1, b1, w2h, w2a, b2, w3_row, b3)

    return out[:B]


def init_params(key, state_dim, action_dim):
    """Deterministic init mirroring the module's _resetParameters().

    lecunishUniformInitializer uses fan_in = weight.size()[0] = out_features
    of the nn.Linear (PyTorch weight is (out, in)), i.e. limit = sqrt(2/128)
    for fc1 and fc2; fc3 weight is U(-0.003, 0.003).
    """
    k1, k2, k3, kb1, kb2, kb3 = jax.random.split(key, 6)
    lim12 = float(jnp.sqrt(2.0 / HIDDEN))

    w1 = jax.random.uniform(k1, (state_dim, HIDDEN), jnp.float32, -lim12, lim12)
    w2 = jax.random.uniform(k2, (HIDDEN + action_dim, HIDDEN), jnp.float32,
                            -lim12, lim12)
    w3 = jax.random.uniform(k3, (HIDDEN, 1), jnp.float32, -0.003, 0.003)

    # Biases keep PyTorch's default Linear init range U(-1/sqrt(fan_in), ...).
    b1 = jax.random.uniform(kb1, (1, HIDDEN), jnp.float32,
                            -1.0 / jnp.sqrt(state_dim), 1.0 / jnp.sqrt(state_dim))
    b2 = jax.random.uniform(kb2, (1, HIDDEN), jnp.float32,
                            -1.0 / jnp.sqrt(HIDDEN + action_dim),
                            1.0 / jnp.sqrt(HIDDEN + action_dim))
    b3 = jax.random.uniform(kb3, (1,), jnp.float32,
                            -1.0 / jnp.sqrt(HIDDEN), 1.0 / jnp.sqrt(HIDDEN))

    return {
        "w1": w1, "b1": b1,
        "w2h": w2[:HIDDEN, :], "w2a": w2[HIDDEN:, :], "b2": b2,
        "w3": w3, "b3": b3,
    }


def reference_forward(states, actions, p):
    h1 = jnp.maximum(states @ p["w1"] + p["b1"], 0.0)
    cat = jnp.concatenate([h1, actions], axis=1)
    w2 = jnp.concatenate([p["w2h"], p["w2a"]], axis=0)
    h2 = jnp.maximum(cat @ w2 + p["b2"], 0.0)
    return h2 @ p["w3"] + p["b3"]


if __name__ == "__main__":
    B, STATE_DIM, ACTION_DIM = 8, 16, 4

    key = jax.random.PRNGKey(0)
    k_s, k_a, k_p, k_s2, k_a2 = jax.random.split(key, 5)
    params = init_params(k_p, STATE_DIM, ACTION_DIM)

    # Small single-tile case.
    states = jax.random.normal(k_s, (B, STATE_DIM), jnp.float32)
    actions = jax.random.normal(k_a, (B, ACTION_DIM), jnp.float32)
    q = jax.block_until_ready(ddpg_critic_forward(states, actions, params))
    q_ref = reference_forward(states, actions, params)
    assert q.shape == (B, 1)
    assert jnp.allclose(q, q_ref, atol=5e-3, rtol=5e-2), "single-tile mismatch"

    # Multi-tile grid path (non-divisible batch exercises padding + grid).
    B2 = 515
    states2 = jax.random.normal(k_s2, (B2, STATE_DIM), jnp.float32)
    actions2 = jax.random.normal(k_a2, (B2, ACTION_DIM), jnp.float32)
    q2 = jax.block_until_ready(
        ddpg_critic_forward(states2, actions2, params, tile_b=256))
    q2_ref = reference_forward(states2, actions2, params)
    assert q2.shape == (B2, 1)
    assert jnp.allclose(q2, q2_ref, atol=5e-3, rtol=5e-2), "gridded mismatch"

    print("KERNEL_OK")
</pallas_src>

<mosaic_0001>
module attributes {stable_mosaic.version = 11 : i64} {
  func.func @_critic_kernel(%arg0: i32, %arg1: memref<8x16xf32, #tpu.memory_space<vmem>>, %arg2: memref<8x8xf32, #tpu.memory_space<vmem>>, %arg3: memref<16x128xbf16, #tpu.memory_space<vmem>>, %arg4: memref<1x128xf32, #tpu.memory_space<vmem>>, %arg5: memref<128x128xbf16, #tpu.memory_space<vmem>>, %arg6: memref<8x128xbf16, #tpu.memory_space<vmem>>, %arg7: memref<1x128xf32, #tpu.memory_space<vmem>>, %arg8: memref<1x128xf32, #tpu.memory_space<vmem>>, %arg9: memref<1xf32, #tpu.memory_space<smem>>, %arg10: memref<8x1xf32, #tpu.memory_space<vmem>>) attributes {dimension_semantics = [#tpu.dimension_semantics<parallel>], iteration_bounds = array<i64: 1>, scalar_prefetch = 0 : i64, scratch_operands = 0 : i64, tpu.core_type = #tpu.core_type<tc>, window_params = [{transform_indices = @transform_0, window_bounds = array<i64: 8, 16>}, {transform_indices = @transform_1, window_bounds = array<i64: 8, 8>}, {pipeline_mode = #tpu.pipeline_mode<synchronous>, transform_indices = @transform_2, window_bounds = array<i64: 16, 128>}, {pipeline_mode = #tpu.pipeline_mode<synchronous>, transform_indices = @transform_3, window_bounds = array<i64: 1, 128>}, {pipeline_mode = #tpu.pipeline_mode<synchronous>, transform_indices = @transform_4, window_bounds = array<i64: 128, 128>}, {pipeline_mode = #tpu.pipeline_mode<synchronous>, transform_indices = @transform_5, window_bounds = array<i64: 8, 128>}, {pipeline_mode = #tpu.pipeline_mode<synchronous>, transform_indices = @transform_6, window_bounds = array<i64: 1, 128>}, {pipeline_mode = #tpu.pipeline_mode<synchronous>, transform_indices = @transform_7, window_bounds = array<i64: 1, 128>}, {transform_indices = @transform_8, window_bounds = array<i64: 1>}, {transform_indices = @transform_9, window_bounds = array<i64: 8, 1>}]} {
    %c0 = arith.constant 0 : index
    %c0_0 = arith.constant 0 : index
    %0 = vector.load %arg1[%c0, %c0_0] : memref<8x16xf32, #tpu.memory_space<vmem>>, vector<8x16xf32>
    %1 = arith.truncf %0 : vector<8x16xf32> to vector<8x16xbf16>
    %c0_1 = arith.constant 0 : index
    %c0_2 = arith.constant 0 : index
    %2 = vector.load %arg2[%c0_1, %c0_2] : memref<8x8xf32, #tpu.memory_space<vmem>>, vector<8x8xf32>
    %3 = arith.truncf %2 : vector<8x8xf32> to vector<8x8xbf16>
    %c0_3 = arith.constant 0 : index
    %c0_4 = arith.constant 0 : index
    %4 = vector.load %arg3[%c0_3, %c0_4] : memref<16x128xbf16, #tpu.memory_space<vmem>>, vector<16x128xbf16>
    %cst = arith.constant dense<0.000000e+00> : vector<8x128xf32>
    %5 = tpu.matmul %1, %4, %cst {dimension_numbers = #tpu.dot_dimension_numbers<[1], [0], [0], [1], [0, 0, 1, 1], [], []>} : vector<8x16xbf16>, vector<16x128xbf16>, vector<8x128xf32> -> vector<8x128xf32>
    %c0_5 = arith.constant 0 : index
    %c0_6 = arith.constant 0 : index
    %6 = vector.load %arg4[%c0_5, %c0_6] : memref<1x128xf32, #tpu.memory_space<vmem>>, vector<1x128xf32>
    %7 = vector.broadcast %6 : vector<1x128xf32> to vector<8x128xf32>
    %8 = arith.addf %5, %7 : vector<8x128xf32>
    %cst_7 = arith.constant 0.000000e+00 : f32
    %9 = vector.broadcast %cst_7 : f32 to vector<8x128xf32>
    %10 = arith.maximumf %8, %9 : vector<8x128xf32>
    %11 = arith.truncf %10 : vector<8x128xf32> to vector<8x128xbf16>
    %c0_8 = arith.constant 0 : index
    %c0_9 = arith.constant 0 : index
    %12 = vector.load %arg5[%c0_8, %c0_9] : memref<128x128xbf16, #tpu.memory_space<vmem>>, vector<128x128xbf16>
    %cst_10 = arith.constant dense<0.000000e+00> : vector<8x128xf32>
    %13 = tpu.matmul %11, %12, %cst_10 {dimension_numbers = #tpu.dot_dimension_numbers<[1], [0], [0], [1], [0, 0, 1, 1], [], []>} : vector<8x128xbf16>, vector<128x128xbf16>, vector<8x128xf32> -> vector<8x128xf32>
    %c0_11 = arith.constant 0 : index
    %c0_12 = arith.constant 0 : index
    %14 = vector.load %arg6[%c0_11, %c0_12] : memref<8x128xbf16, #tpu.memory_space<vmem>>, vector<8x128xbf16>
    %cst_13 = arith.constant dense<0.000000e+00> : vector<8x128xf32>
    %15 = tpu.matmul %3, %14, %cst_13 {dimension_numbers = #tpu.dot_dimension_numbers<[1], [0], [0], [1], [0, 0, 1, 1], [], []>} : vector<8x8xbf16>, vector<8x128xbf16>, vector<8x128xf32> -> vector<8x128xf32>
    %16 = arith.addf %13, %15 : vector<8x128xf32>
    %c0_14 = arith.constant 0 : index
    %c0_15 = arith.constant 0 : index
    %17 = vector.load %arg7[%c0_14, %c0_15] : memref<1x128xf32, #tpu.memory_space<vmem>>, vector<1x128xf32>
    %18 = vector.broadcast %17 : vector<1x128xf32> to vector<8x128xf32>
    %19 = arith.addf %16, %18 : vector<8x128xf32>
    %cst_16 = arith.constant 0.000000e+00 : f32
    %20 = vector.broadcast %cst_16 : f32 to vector<8x128xf32>
    %21 = arith.maximumf %19, %20 : vector<8x128xf32>
    %c0_17 = arith.constant 0 : index
    %c0_18 = arith.constant 0 : index
    %22 = vector.load %arg8[%c0_17, %c0_18] : memref<1x128xf32, #tpu.memory_space<vmem>>, vector<1x128xf32>
    %23 = vector.broadcast %22 : vector<1x128xf32> to vector<8x128xf32>
    %24 = arith.mulf %21, %23 : vector<8x128xf32>
    %cst_19 = arith.constant dense<0.000000e+00> : vector<8xf32>
    %25 = vector.multi_reduction <add>, %24, %cst_19 [1] : vector<8x128xf32> to vector<8xf32>
    %26 = vector.shape_cast %25 : vector<8xf32> to vector<8x1xf32>
    %c0_20 = arith.constant 0 : index
    %27 = memref.load %arg9[%c0_20] : memref<1xf32, #tpu.memory_space<smem>>
    %28 = vector.broadcast %27 : f32 to vector<8x1xf32>
    %29 = arith.addf %26, %28 : vector<8x1xf32>
    %c0_21 = arith.constant 0 : index
    %c0_22 = arith.constant 0 : index
    %30 = vector.load %arg10[%c0_21, %c0_22] : memref<8x1xf32, #tpu.memory_space<vmem>>, vector<8x1xf32>
    tpu.vector_store %arg10[%c0_21, %c0_22], %29 {strides = array<i32>} : memref<8x1xf32, #tpu.memory_space<vmem>>, vector<8x1xf32>,
    return
  }
  func.func @transform_0(%arg0: i32) -> (i32, i32) {
    %c0_i32 = arith.constant 0 : i32
    %c0_i32_0 = arith.constant 0 : i32
    return %arg0, %c0_i32 : i32, i32
  }
  func.func @transform_1(%arg0: i32) -> (i32, i32) {
    %c0_i32 = arith.constant 0 : i32
    %c0_i32_0 = arith.constant 0 : i32
    return %arg0, %c0_i32 : i32, i32
  }
  func.func @transform_2(%arg0: i32) -> (i32, i32) {
    %c0_i32 = arith.constant 0 : i32
    %c0_i32_0 = arith.constant 0 : i32
    %c0_i32_1 = arith.constant 0 : i32
    return %c0_i32, %c0_i32_0 : i32, i32
  }
  func.func @transform_3(%arg0: i32) -> (i32, i32) {
    %c0_i32 = arith.constant 0 : i32
    %c0_i32_0 = arith.constant 0 : i32
    %c0_i32_1 = arith.constant 0 : i32
    return %c0_i32, %c0_i32_0 : i32, i32
  }
  func.func @transform_4(%arg0: i32) -> (i32, i32) {
    %c0_i32 = arith.constant 0 : i32
    %c0_i32_0 = arith.constant 0 : i32
    %c0_i32_1 = arith.constant 0 : i32
    return %c0_i32, %c0_i32_0 : i32, i32
  }
  func.func @transform_5(%arg0: i32) -> (i32, i32) {
    %c0_i32 = arith.constant 0 : i32
    %c0_i32_0 = arith.constant 0 : i32
    %c0_i32_1 = arith.constant 0 : i32
    return %c0_i32, %c0_i32_0 : i32, i32
  }
  func.func @transform_6(%arg0: i32) -> (i32, i32) {
    %c0_i32 = arith.constant 0 : i32
    %c0_i32_0 = arith.constant 0 : i32
    %c0_i32_1 = arith.constant 0 : i32
    return %c0_i32, %c0_i32_0 : i32, i32
  }
  func.func @transform_7(%arg0: i32) -> (i32, i32) {
    %c0_i32 = arith.constant 0 : i32
    %c0_i32_0 = arith.constant 0 : i32
    %c0_i32_1 = arith.constant 0 : i32
    return %c0_i32, %c0_i32_0 : i32, i32
  }
  func.func @transform_8(%arg0: i32) -> i32 {
    %c0_i32 = arith.constant 0 : i32
    %c0_i32_0 = arith.constant 0 : i32
    return %c0_i32 : i32
  }
  func.func @transform_9(%arg0: i32) -> (i32, i32) {
    %c0_i32 = arith.constant 0 : i32
    %c0_i32_0 = arith.constant 0 : i32
    return %arg0, %c0_i32 : i32, i32
  }
}

</mosaic_0001>

<bundles_post_ra>
// kernel: tpu_custom_call.1
= control target key start
LH: loop header
LB: loop body
LE: loop exit
PB: predicated region body
PF: predicated region fallthrough
CT: control target
= control target key end

     0   :  { %15 = vsyncpa [#allocation4], 0  ;;  %s587_s0 = inlined_call_operand.hbm [shape: f32[8,16], index: 0, kind: input, shape index: {}]   ;;  %s588_s1 = inlined_call_operand.hbm [shape: f32[8,8], index: 1, kind: input, shape index: {}]   ;;  %s589_s2 = inlined_call_operand.hbm [shape: bf16[16,128], index: 2, kind: input, shape index: {}]   ;;  %s590_s3 = inlined_call_operand.vmem [shape: f32[1,128], index: 3, kind: input, shape index: {}]   ;;  %s591_s4 = inlined_call_operand.hbm [shape: bf16[128,128], index: 4, kind: input, shape index: {}]   ;;  %s592_s5 = inlined_call_operand.vmem [shape: bf16[8,128], index: 5, kind: input, shape index: {}]   ;;  %s593_s6 = inlined_call_operand.vmem [shape: f32[1,128], index: 6, kind: input, shape index: {}]   ;;  %s594_s7 = inlined_call_operand.vmem [shape: f32[1,128], index: 7, kind: input, shape index: {}]   ;;  %s595_s8 = inlined_call_operand.<no memory space> [shape: f32[1], index: 8, kind: input, shape index: {}]   ;;  %s596_s9 = inlined_call_operand.vmem [shape: f32[8,1], index: 9, kind: output, shape index: {}]  }
   0x1   :  { %16 = vsyncpa [#allocation6], 0 }
   0x2   :  { %17 = vsyncpa [#allocation9], 0  ;;  %s496_s30 = smov [#allocation5]   ;;  %s497_s11 = smov [#allocation3]  }
   0x3   :  { %s34_s10 = sshll.u32 %s496_s30, 4  ;;  %s24_s12 = sshll.u32 %s497_s11, 4  ;;  %s35_s10 = int_to_ptr.vmem [resolvable:$true] %s34_s10  ;;  %s25_s12 = int_to_ptr.vmem [resolvable:$true] %s24_s12 }
   0x4   :  { %s418_s13 = scalar_lea.vmem %s35_s10, 128  ;;  %p423_p1 = scmp.lt.s32.totalorder %s35_s10, %s35_s10 }
   0x5   :  { %p419_p0 = scmp.ne.s32.totalorder %s35_s10, %s418_s13  ;;  %p424_p2 = scmp.lt.s32.totalorder %s418_s13, %s418_s13 }
   0x7   :  { %p425_p3 = por %p424_p2, %p423_p1 }
   0x9   :  { %p426_p4 = pnand %p425_p3, %p419_p0 }
   0xb   :  { %429 = shalt.err (!%p426_p4)
}
   0xc   :  { %37 = dma.hbm_to_vmem [thread:$0]  %s588_s1, 128, %s35_s10, [#allocation6]  }
   0xd   :  { %s438_s16 = scalar_lea.vmem %s25_s12, 128  ;;  %p443_p6 = scmp.lt.s32.totalorder %s25_s12, %s25_s12 }
   0xe   :  { %p439_p5 = scmp.ne.s32.totalorder %s25_s12, %s438_s16  ;;  %p444_p7 = scmp.lt.s32.totalorder %s438_s16, %s438_s16 }
  0x10   :  { %p445_p8 = por %p444_p7, %p443_p6 }
  0x12   :  { %p446_p9 = pnand %p445_p8, %p439_p5 }
  0x14   :  { %449 = shalt.err (!%p446_p9)
}
  0x15   :  { %27 = dma.hbm_to_vmem [thread:$0]  %s587_s0, 128, %s25_s12, [#allocation4]  }
  0x16   :  { %s498_s19 = smov [#allocation7]  }
  0x17   :  { %s43_s20 = sshll.u32 %s498_s19, 4  ;;  %s44_s20 = int_to_ptr.vmem [resolvable:$true] %s43_s20 }
  0x18   :  { %s458_s21 = scalar_lea.vmem %s44_s20, 128  ;;  %p463_p11 = scmp.lt.s32.totalorder %s44_s20, %s44_s20 }
  0x19   :  { %p459_p10 = scmp.ne.s32.totalorder %s44_s20, %s458_s21  ;;  %p464_p12 = scmp.lt.s32.totalorder %s458_s21, %s458_s21 }
  0x1b   :  { %p465_p13 = por %p464_p12, %p463_p11 }
  0x1d   :  { %p466_p0 = pnand %p465_p13, %p459_p10 }
  0x1f   :  { %469 = shalt.err (!%p466_p0)
}
  0x20   :  { %s499_s1 = smov 64   ;;  %s500_s22 = smov 4  }
  0x21   :  { %49 = dma.hbm_to_vmem [thread:$0]  %s589_s2, 128, %s44_s20, [#allocation6], %s499_s1, %s499_s1, %s500_s22  }
  0x22   :  { %s501_s25 = smov [#allocation8]  }
  0x23   :  { %s57_s26 = sshll.u32 %s501_s25, 4  ;;  %s58_s26 = int_to_ptr.vmem [resolvable:$true] %s57_s26 }
  0x24   :  { %s478_s0 = scalar_lea.vmem %s58_s26, 1024  ;;  %p483_p2 = scmp.lt.s32.totalorder %s58_s26, %s58_s26 }
  0x25   :  { %p479_p1 = scmp.ne.s32.totalorder %s58_s26, %s478_s0  ;;  %p484_p3 = scmp.lt.s32.totalorder %s478_s0, %s478_s0 }
  0x27   :  { %p485_p4 = por %p484_p3, %p483_p2 }
  0x29   :  { %p486_p5 = pnand %p485_p4, %p479_p1 }
  0x2b   :  { %489 = shalt.err (!%p486_p5)
}
  0x2c   :  { %63 = dma.hbm_to_vmem [thread:$0]  %s591_s4, 1024, %s58_s26, [#allocation9], %s499_s1, %s499_s1, %s500_s22  }
  0x2d   :  { %490 = dma.done.wait [#allocation4], 128  }
  0x2e   :  { %491 = vsyncadd [#allocation4], 4294967168 }
  0x2f   :  { %492 = dma.done.wait [#allocation6], 256  }
  0x30   :  { %493 = vsyncadd [#allocation6], 4294967040 }
  0x31   :  { %494 = dma.done.wait [#allocation9], 1024  }
  0x32   :  { %495 = vsyncadd [#allocation9], 4294966272  ;;  %v502_v0 = vmov 0.0   ;;  %vm503_vm0 = vmmov 0   ;;  %v401_v1 = vld [vmem:[#allocation7] sm:$0xff]   ;;  %v85_v2 = vld [vmem:[#allocation3] sm:$0xff]  ;;  %v323_v38 = vstv %s595_s8 }
  0x33   :  { %361 = vmatprep.subr.bf16.mxu1 %v502_v0  ;;  %363 = vmatprep.mubr.msk.bf16.mxu1 %vm503_vm0, %v502_v0  ;;  %v86_v3 = vpack.c.bf16 %v85_v2, %v85_v2  ;;  %vm104_vm1 = vcmask 130048   ;;  %v402_v4 = vld [vmem:[#allocation8 + $0x38] sm:$0xff]   ;;  %v403_v5 = vld [vmem:[#allocation8 + $0x30] sm:$0xff]   ;;  %vm171_vm2 = vcmask 1043456   ;;  %v166_v6 = vld [vmem:[%s592_s5] sm:$0xf] }
  0x34   :  { %373 = vmatprep.subr.bf16.mxu0 %v502_v0  ;;  %389 = vmatprep.mubr.msk.bf16.mxu0 %vm503_vm0, %v502_v0  ;;  %v404_v7 = vld [vmem:[#allocation8 + $0x28] sm:$0xff]   ;;  %v173_v8 = vsel %vm171_vm2, %v166_v6, 0  ;;  %v405_v9 = vld [vmem:[#allocation8 + $0x20] sm:$0xff]   ;;  %v406_v10 = vld [vmem:[#allocation8 + $0x18] sm:$0xff]   ;;  %vm167_vm3 = vcmask 64512   ;;  %vm325_vm4 = vcmask 7168  }
  0x35   :  { %362 = vmatpush3.bf16.msra.mxu1 %v401_v1  ;;  %374 = vmatpush3.bf16.msra.mxu0 %v402_v4  ;;  %v407_v11 = vld [vmem:[#allocation8 + $0x10] sm:$0xff]   ;;  %v408_v12 = vld [vmem:[#allocation8 + $0x8] sm:$0xff]   ;;  %v409_v15 = vld [vmem:[#allocation8] sm:$0xff]  }
  0x36   :  { %367 = vmatprep.subr.bf16.mxu1 %v502_v0  ;;  %375 = vmatprep.subr.bf16.mxu0 %v502_v0  ;;  %v87_v13 = vld [vmem:[#allocation5] sm:$0xff]  ;;  %v334_v16 = vld [vmem:[%s590_s3] ss:$0 sm:$0xff] }
  0x37   :  { %v88_v14 = vpack.c.bf16 %v87_v13, %v87_v13  ;;  %v346_v29 = vld [vmem:[%s593_s6] ss:$0 sm:$0xff] }
  0x38   :  { %364 = vmatmul.mubr.msk.bf16.vlgmr.msra.gmra.mxu1 %vm104_vm1, %v86_v3  ;;  %v347_v34 = vld [vmem:[%s594_s7] ss:$0 sm:$0xff] }
  0x39   :  { %369 = vmatprep.mubr.msk.bf16.mxu1 %vm503_vm0, %v502_v0  ;;  %376 = vmatpush3.bf16.msra.mxu0 %v403_v5 }
  0x3a   :  { %377 = vmatprep.subr.bf16.mxu0 %v502_v0  ;;  %368 = vmatpush3.bf16.msra.mxu1 %v173_v8 }
  0x3d   :  { %378 = vmatpush3.bf16.msra.mxu0 %v404_v7 }
  0x3e   :  { %379 = vmatprep.subr.bf16.mxu0 %v502_v0 }
  0x40   :  { %370 = vmatmul.mubr.msk.bf16.vlgmr.msra.gmra.mxu1 %vm167_vm3, %v88_v14 }
  0x41   :  { %380 = vmatpush3.bf16.msra.mxu0 %v405_v9 }
  0x42   :  { %381 = vmatprep.subr.bf16.mxu0 %v502_v0 }
  0x45   :  { %382 = vmatpush3.bf16.msra.mxu0 %v406_v10 }
  0x46   :  { %383 = vmatprep.subr.bf16.mxu0 %v502_v0 }
  0x49   :  { %384 = vmatpush3.bf16.msra.mxu0 %v407_v11 }
  0x4a   :  { %385 = vmatprep.subr.bf16.mxu0 %v502_v0 }
  0x4d   :  { %386 = vmatpush3.bf16.msra.mxu0 %v408_v12 }
  0x4e   :  { %387 = vmatprep.subr.bf16.mxu0 %v502_v0 }
  0x51   :  { %388 = vmatpush3.bf16.msra.mxu0 %v409_v15 }
  0xf8   :  { %v142_v17 = vpop.f32.mrf.mxu1 }
  0xf9   :  { %v143_v18 = vadd.f32 %v334_v16, %v142_v17 }
  0xfa   :  { %v365_v19 = vpop.f32.mrf.mxu1 }
  0xfb   :  { %v148_v20 = vmax.f32 %v143_v18, 0.0 }
  0xfc   :  { %v145_v21 = vpop.f32.mrf.mxu1 }
  0xfd   :  { %v149_v22 = vpack.c.bf16 %v148_v20, %v148_v20 }
  0xfe   :  { %v366_v23 = vpop.f32.mrf.mxu1 }
  0xff   :  { %390 = vmatmul.mubr.bf16.vlgmr.msra.gmra.mxu0 %v149_v22 }
 0x100   :  { %v209_v24 = vpop.f32.mrf.mxu1 }
 0x102   :  { %v371_v25 = vpop.f32.mrf.mxu1 }
 0x104   :  { %v212_v26 = vpop.f32.mrf.mxu1 }
 0x106   :  { %v372_v27 = vpop.f32.mrf.mxu1 }
 0x1bf   :  { %v297_v28 = vpop.f32.mrf.mxu0 }
 0x1c0   :  { %v298_v30 = vadd.f32 %v297_v28, %v209_v24 }
 0x1c1   :  { %v391_v31 = vpop.f32.mrf.mxu0 }
 0x1c2   :  { %v310_v32 = vadd.f32 %v346_v29, %v298_v30 }
 0x1c3   :  { %v300_v33 = vpop.f32.mrf.mxu0 }
 0x1c4   :  { %v311_v35 = vmax.f32 %v310_v32, 0.0 }
 0x1c5   :  { %v392_v36 = vpop.f32.mrf.mxu0 }
 0x1c6   :  { %v319_v37 = vmul.f32 %v347_v34, %v311_v35 }
 0x1c8   :  { %320 = vadd.xlane.f32.xlu0 %v319_v37 }
 0x251   :  { %v321_v39 = vpop.xlane.xlu0 %320 }
 0x252   :  { %v324_v40 = vadd.f32 %v323_v38, %v321_v39 }
 0x254   :  { %326 = vst.msk [vmem:[%s596_s9] sm:$0xff] %vm325_vm4, %v324_v40 }
 0x255   :  { %331 = vsyncpa [#allocation4], 1 }
 0x256   :  { %332 = vsyncpa [#allocation6], 1 }
 0x257   :  { %333 = vsyncpa [#allocation9], 1 }

</bundles_post_ra>
